<compile_context>
chip_gen: v5e
topology: v5e:2x2
jax: 0.10.0
libtpu: 0.0.40
codegen_flags: <defaults>
</compile_context>

<pallas_src>
import functools

import jax
import jax.numpy as jnp
from jax import lax
from jax.experimental import pallas as pl
from jax.experimental.pallas import tpu as pltpu


# ----------------------------------------------------------------------------
# Fused kernel: relu(x @ W' + shift'), stored in final output memory order.
#   x_ref     : (th, W, Cin)          NHWC rows of the input
#   w_ref     : (Cin, 4*Cout)         columns ordered (ki, kj, co), BN-scaled
#   shift_ref : (1, 4*Cout)           folded bias*scale + shift
#   o_ref     : (th, 2, W, 2*Cout)    (h, ki, w, (kj, co))  == final NHWC order
# ----------------------------------------------------------------------------
def _fused_conv_bn_relu_kernel(x_ref, w_ref, shift_ref, o_ref):
    th, w, cin = x_ref.shape
    two_cout = o_ref.shape[-1]
    x2 = x_ref[...].reshape(th * w, cin)          # sublane merge (free for W%8==0)
    y = jnp.dot(x2, w_ref[...], preferred_element_type=jnp.float32)
    y = jnp.maximum(y + shift_ref[...], 0.0)      # (th*W, 4*Cout)
    # Column group ki is contiguous ([ki*2C:(ki+1)*2C], ordered (kj, co)),
    # which is exactly the (2w+kj, co) order of output row 2h+ki.
    o_ref[:, 0, :, :] = y[:, :two_cout].reshape(th, w, two_cout)
    o_ref[:, 1, :, :] = y[:, two_cout:].reshape(th, w, two_cout)


# ----------------------------------------------------------------------------
# Feature detection: single-buffered constant blocks (pl.Buffered(1)).
# ----------------------------------------------------------------------------
def _probe_kernel(x_ref, o_ref):
    o_ref[...] = x_ref[...]


@functools.lru_cache(maxsize=None)
def _single_buffer_supported():
    """True iff pl.BlockSpec(..., pipeline_mode=pl.Buffered(1)) compiles+runs."""
    try:
        fn = pl.pallas_call(
            _probe_kernel,
            out_shape=jax.ShapeDtypeStruct((8, 128), jnp.float32),
            grid=(1,),
            in_specs=[pl.BlockSpec((8, 128), lambda i: (0, 0),
                                   pipeline_mode=pl.Buffered(1))],
            out_specs=pl.BlockSpec((8, 128), lambda i: (0, 0)),
        )
        jax.block_until_ready(fn(jnp.zeros((8, 128), jnp.float32)))
        return True
    except Exception:
        return False


# ----------------------------------------------------------------------------
# Static per-generation / per-shape configuration.
# ----------------------------------------------------------------------------
def _vmem_capacity_bytes():
    try:
        return int(pltpu.get_tpu_info().vmem_capacity_bytes)
    except Exception:
        return 64 << 20                           # conservative (v7x per-TC VMEM)


def _select_config(N, Cin, H, W, Cout):
    NH, K4 = N * H, 4 * Cout
    cap = _vmem_capacity_bytes()
    big_vmem = cap >= (96 << 20)                  # v5e/v6e: 128 MiB; v7x: 64 MiB
    vmem_ceiling = (64 << 20) if big_vmem else (40 << 20)
    # Target matmul row tile tm = th*W: larger on v5e/v6e, smaller on v7x /
    # wide outputs (amortizes ~0.35 us/step while keeping pipelining headroom).
    if big_vmem:
        tm_target = 1024 if K4 <= 1024 else 512
    else:
        tm_target = 512 if K4 < 2048 else 256
    th = max(1, min(NH, int(round(tm_target / max(W, 1)))))

    single_buffer = _single_buffer_supported()
    wgt_bufs = 1 if single_buffer else 2

    def footprint(th_):
        x_blk = 2 * th_ * W * Cin * 4             # double-buffered input block
        o_blk = 2 * th_ * W * K4 * 4              # double-buffered output block
        y_tmp = th_ * W * K4 * 4                  # in-kernel matmul result
        consts = wgt_bufs * (Cin * K4 + K4) * 4   # resident weights + shift
        return x_blk + o_blk + y_tmp + consts + (2 << 20)

    while th > 1 and footprint(th) > int(0.8 * vmem_ceiling):
        th = max(1, th // 2)
    nh_pad = -(-NH // th) * th                    # pad rows; never gcd/whole-array
    vmem_limit = int(min(vmem_ceiling, max(footprint(th) + (4 << 20), 24 << 20)))
    return th, nh_pad, vmem_limit, single_buffer


# ----------------------------------------------------------------------------
# Forward
# ----------------------------------------------------------------------------
@functools.partial(
    jax.jit, static_argnames=("th", "nh_pad", "vmem_limit", "single_buffer"))
def _forward_impl(x_nchw, weight, bias, gamma, beta, eps,
                  *, th, nh_pad, vmem_limit, single_buffer):
    N, Cin, H, W = x_nchw.shape
    Cout = weight.shape[1]
    NH, M, K4 = N * H, N * H * W, 4 * Cout
    two_cout = 2 * Cout
    f32 = jnp.float32

    # x layout plumbing (small tensor; one XLA pass shared by the stats matmul
    # and the kernel input).
    # TODO(synk): fold the NCHW->NHWC transpose of x into the kernel itself.
    x_nhwc = jnp.transpose(x_nchw, (0, 2, 3, 1))                 # (N, H, W, Cin)
    x2d = x_nhwc.reshape(M, Cin)

    # BN batch statistics, analytically from x (tiny outputs, plain XLA).
    # Centered Gram -> no catastrophic cancellation for large M / offsets.
    w2d = jnp.transpose(weight, (0, 2, 3, 1)).reshape(Cin, K4)   # cols (ki,kj,co)
    b4 = jnp.tile(bias, 4)
    mf = f32(M)
    xbar = jnp.sum(x2d, axis=0) / mf                             # (Cin,)
    xc = x2d - xbar[None, :]
    gram_c = lax.dot_general(xc, xc, (((0,), (0,)), ((), ())),
                             preferred_element_type=f32)         # (Cin, Cin)
    mean_col = xbar @ w2d + b4                                   # (K4,)
    var_col = jnp.sum(w2d * (gram_c @ w2d), axis=0) / mf         # (K4,)
    mean_pos = mean_col.reshape(4, Cout)
    var_pos = var_col.reshape(4, Cout)
    mean_c = jnp.mean(mean_pos, axis=0)                          # channel mean
    var_c = jnp.mean(var_pos + (mean_pos - mean_c[None, :]) ** 2, axis=0)

    inv_std = lax.rsqrt(var_c + eps)
    scale_c = gamma * inv_std
    offset_c = beta - mean_c * scale_c
    scale4 = jnp.tile(scale_c, 4)
    offset4 = jnp.tile(offset_c, 4)
    w_fused = w2d * scale4[None, :]                              # (Cin, K4)
    shift_fused = (b4 * scale4 + offset4).reshape(1, K4)         # (1, K4)

    # Pad rows so th always divides them; padded rows produce relu(shift') and
    # are sliced off (the slice fuses into the final transpose).
    x3d = x_nhwc.reshape(NH, W, Cin)
    if nh_pad != NH:
        x3d = jnp.pad(x3d, ((0, nh_pad - NH), (0, 0), (0, 0)))

    const_kwargs = {"pipeline_mode": pl.Buffered(1)} if single_buffer else {}
    # TODO(synk): for very large Cin*4*Cout (>~16 MiB resident weights on v7x),
    # add a second grid axis over the two ki column groups to halve weight VMEM.
    # TODO(synk): if 2*Cout < 128 the output lane dim is masked (vst.msk); pad
    # Cout when such tiny channel counts ever become writeback-bound.
    # TODO(synk): emit bf16 output / bf16 matmul operands if downstream allows
    # (halves the dominant HBM writeback).
    out = pl.pallas_call(
        _fused_conv_bn_relu_kernel,
        out_shape=jax.ShapeDtypeStruct((nh_pad, 2, W, two_cout), f32),
        grid=(nh_pad // th,),
        in_specs=[
            pl.BlockSpec((th, W, Cin), lambda i: (i, 0, 0)),
            pl.BlockSpec((Cin, K4), lambda i: (0, 0), **const_kwargs),
            pl.BlockSpec((1, K4), lambda i: (0, 0), **const_kwargs),
        ],
        out_specs=pl.BlockSpec((th, 2, W, two_cout), lambda i: (i, 0, 0, 0)),
        compiler_params=pltpu.CompilerParams(
            dimension_semantics=("parallel",),
            vmem_limit_bytes=vmem_limit),
    )(x3d, w_fused, shift_fused)

    # Kernel already wrote (n, h, ki, w, kj, co) order -> free reshape plus the
    # single mandatory NHWC->NCHW transpose.
    out = out[:NH].reshape(N, 2 * H, 2 * W, Cout)
    return jnp.transpose(out, (0, 3, 1, 2))


def expansion_block_forward(x_nchw, weight, bias, gamma, beta, *, eps=1e-5):
    """ConvTranspose2d(k=2, s=2) -> BatchNorm2d(training batch stats) -> ReLU.

    x_nchw : (N, Cin, H, W) f32, weight : (Cin, Cout, 2, 2) f32 (PyTorch layout),
    bias/gamma/beta : (Cout,) f32.  Returns (N, Cout, 2H, 2W) f32.
    """
    N, Cin, H, W = x_nchw.shape
    Cout = weight.shape[1]
    th, nh_pad, vmem_limit, single_buffer = _select_config(N, Cin, H, W, Cout)
    return _forward_impl(x_nchw, weight, bias, gamma, beta, eps,
                         th=th, nh_pad=nh_pad, vmem_limit=vmem_limit,
                         single_buffer=single_buffer)


# ----------------------------------------------------------------------------
# Pure-JAX reference (independent math path) for validation
# ----------------------------------------------------------------------------
def reference_forward(x_nchw, weight, bias, gamma, beta, eps=1e-5):
    N, Cin, H, W = x_nchw.shape
    Cout = weight.shape[1]
    t = jnp.einsum("nihw,ioab->nohawb", x_nchw, weight)          # (N,Cout,H,2,W,2)
    y = t.reshape(N, Cout, 2 * H, 2 * W) + bias[None, :, None, None]
    mean = jnp.mean(y, axis=(0, 2, 3), keepdims=True)
    var = jnp.mean((y - mean) ** 2, axis=(0, 2, 3), keepdims=True)
    yhat = (y - mean) * lax.rsqrt(var + eps)
    yhat = yhat * gamma[None, :, None, None] + beta[None, :, None, None]
    return jnp.maximum(yhat, 0.0)


if __name__ == "__main__":
    key = jax.random.PRNGKey(0)

    def run_case(N, Cin, Cout, H, W, k):
        k_x, k_w, k_b = jax.random.split(k, 3)
        x = jax.random.normal(k_x, (N, Cin, H, W), dtype=jnp.float32)
        weight = jax.random.normal(k_w, (Cin, Cout, 2, 2), dtype=jnp.float32) * 0.1
        bias = jax.random.normal(k_b, (Cout,), dtype=jnp.float32) * 0.1
        gamma = jnp.ones((Cout,), dtype=jnp.float32)     # BatchNorm2d default init
        beta = jnp.zeros((Cout,), dtype=jnp.float32)

        out = jax.block_until_ready(
            expansion_block_forward(x, weight, bias, gamma, beta))
        ref = reference_forward(x, weight, bias, gamma, beta)
        assert out.shape == (N, Cout, 2 * H, 2 * W), out.shape
        err = float(jnp.max(jnp.abs(out - ref)))
        assert jnp.allclose(out, ref, atol=1e-4, rtol=1e-4), err

    k1, k2 = jax.random.split(key)
    run_case(N=2, Cin=8, Cout=16, H=16, W=16, k=k1)   # main small case
    run_case(N=2, Cin=8, Cout=16, H=40, W=16, k=k2)   # exercises row padding / grid>1

    print("KERNEL_OK")
</pallas_src>

<mosaic_0001>
module attributes {stable_mosaic.version = 11 : i64} {
  func.func @_probe_kernel(%arg0: i32, %arg1: memref<8x128xf32, #tpu.memory_space<vmem>>, %arg2: memref<8x128xf32, #tpu.memory_space<vmem>>) attributes {dimension_semantics = [#tpu.dimension_semantics<arbitrary>], iteration_bounds = array<i64: 1>, scalar_prefetch = 0 : i64, scratch_operands = 0 : i64, tpu.core_type = #tpu.core_type<tc>, window_params = [{pipeline_mode = #tpu.pipeline_mode<synchronous>, transform_indices = @transform_0, window_bounds = array<i64: 8, 128>}, {pipeline_mode = #tpu.pipeline_mode<synchronous>, transform_indices = @transform_1, window_bounds = array<i64: 8, 128>}]} {
    %c0 = arith.constant 0 : index
    %c0_0 = arith.constant 0 : index
    %0 = vector.load %arg1[%c0, %c0_0] : memref<8x128xf32, #tpu.memory_space<vmem>>, vector<8x128xf32>
    %c0_1 = arith.constant 0 : index
    %c0_2 = arith.constant 0 : index
    %1 = vector.load %arg2[%c0_1, %c0_2] : memref<8x128xf32, #tpu.memory_space<vmem>>, vector<8x128xf32>
    tpu.vector_store %arg2[%c0_1, %c0_2], %0 {strides = array<i32>} : memref<8x128xf32, #tpu.memory_space<vmem>>, vector<8x128xf32>,
    return
  }
  func.func @transform_0(%arg0: i32) -> (i32, i32) {
    %c0_i32 = arith.constant 0 : i32
    %c0_i32_0 = arith.constant 0 : i32
    %c0_i32_1 = arith.constant 0 : i32
    return %c0_i32, %c0_i32_0 : i32, i32
  }
  func.func @transform_1(%arg0: i32) -> (i32, i32) {
    %c0_i32 = arith.constant 0 : i32
    %c0_i32_0 = arith.constant 0 : i32
    %c0_i32_1 = arith.constant 0 : i32
    return %c0_i32, %c0_i32_0 : i32, i32
  }
}

module attributes {stable_mosaic.version = 11 : i64} {
  func.func @_fused_conv_bn_relu_kernel(%arg0: i32, %arg1: memref<32x16x8xf32, #tpu.memory_space<vmem>>, %arg2: memref<8x64xf32, #tpu.memory_space<vmem>>, %arg3: memref<1x64xf32, #tpu.memory_space<vmem>>, %arg4: memref<32x2x16x32xf32, #tpu.memory_space<vmem>>) attributes {dimension_semantics = [#tpu.dimension_semantics<parallel>], iteration_bounds = array<i64: 1>, scalar_prefetch = 0 : i64, scratch_operands = 0 : i64, tpu.core_type = #tpu.core_type<tc>, window_params = [{transform_indices = @transform_0, window_bounds = array<i64: 32, 16, 8>}, {pipeline_mode = #tpu.pipeline_mode<synchronous>, transform_indices = @transform_1, window_bounds = array<i64: 8, 64>}, {pipeline_mode = #tpu.pipeline_mode<synchronous>, transform_indices = @transform_2, window_bounds = array<i64: 1, 64>}, {transform_indices = @transform_3, window_bounds = array<i64: 32, 2, 16, 32>}]} {
    %c0 = arith.constant 0 : index
    %c0_0 = arith.constant 0 : index
    %c0_1 = arith.constant 0 : index
    %0 = vector.load %arg1[%c0, %c0_0, %c0_1] : memref<32x16x8xf32, #tpu.memory_space<vmem>>, vector<32x16x8xf32>
    %1 = vector.shape_cast %0 : vector<32x16x8xf32> to vector<512x8xf32>
    %c0_2 = arith.constant 0 : index
    %c0_3 = arith.constant 0 : index
    %2 = vector.load %arg2[%c0_2, %c0_3] : memref<8x64xf32, #tpu.memory_space<vmem>>, vector<8x64xf32>
    %cst = arith.constant dense<0.000000e+00> : vector<512x64xf32>
    %3 = tpu.matmul %1, %2, %cst {dimension_numbers = #tpu.dot_dimension_numbers<[1], [0], [0], [1], [0, 0, 1, 1], [], []>} : vector<512x8xf32>, vector<8x64xf32>, vector<512x64xf32> -> vector<512x64xf32>
    %c0_4 = arith.constant 0 : index
    %c0_5 = arith.constant 0 : index
    %4 = vector.load %arg3[%c0_4, %c0_5] : memref<1x64xf32, #tpu.memory_space<vmem>>, vector<1x64xf32>
    %5 = vector.broadcast %4 : vector<1x64xf32> to vector<512x64xf32>
    %6 = arith.addf %3, %5 : vector<512x64xf32>
    %cst_6 = arith.constant 0.000000e+00 : f32
    %7 = vector.broadcast %cst_6 : f32 to vector<512x64xf32>
    %8 = arith.maximumf %6, %7 : vector<512x64xf32>
    %9 = vector.extract_strided_slice %8 {offsets = [0, 0], sizes = [512, 32], strides = [1, 1]} : vector<512x64xf32> to vector<512x32xf32>
    %10 = vector.shape_cast %9 : vector<512x32xf32> to vector<32x16x32xf32>
    %c0_7 = arith.constant 0 : index
    %c0_8 = arith.constant 0 : index
    %c0_9 = arith.constant 0 : index
    %c0_10 = arith.constant 0 : index
    %11 = vector.load %arg4[%c0_7, %c0_8, %c0_9, %c0_10] : memref<32x2x16x32xf32, #tpu.memory_space<vmem>>, vector<32x1x16x32xf32>
    %12 = vector.shape_cast %11 : vector<32x1x16x32xf32> to vector<32x16x32xf32>
    %13 = vector.shape_cast %10 : vector<32x16x32xf32> to vector<32x1x16x32xf32>
    tpu.vector_store %arg4[%c0_7, %c0_8, %c0_9, %c0_10], %13 {strides = array<i32>} : memref<32x2x16x32xf32, #tpu.memory_space<vmem>>, vector<32x1x16x32xf32>,
    %14 = vector.extract_strided_slice %8 {offsets = [0, 32], sizes = [512, 32], strides = [1, 1]} : vector<512x64xf32> to vector<512x32xf32>
    %15 = vector.shape_cast %14 : vector<512x32xf32> to vector<32x16x32xf32>
    %c0_11 = arith.constant 0 : index
    %c1 = arith.constant 1 : index
    %c0_12 = arith.constant 0 : index
    %c0_13 = arith.constant 0 : index
    %16 = vector.load %arg4[%c0_11, %c1, %c0_12, %c0_13] : memref<32x2x16x32xf32, #tpu.memory_space<vmem>>, vector<32x1x16x32xf32>
    %17 = vector.shape_cast %16 : vector<32x1x16x32xf32> to vector<32x16x32xf32>
    %18 = vector.shape_cast %15 : vector<32x16x32xf32> to vector<32x1x16x32xf32>
    tpu.vector_store %arg4[%c0_11, %c1, %c0_12, %c0_13], %18 {strides = array<i32>} : memref<32x2x16x32xf32, #tpu.memory_space<vmem>>, vector<32x1x16x32xf32>,
    return
  }
  func.func @transform_0(%arg0: i32) -> (i32, i32, i32) {
    %c0_i32 = arith.constant 0 : i32
    %c0_i32_0 = arith.constant 0 : i32
    %c0_i32_1 = arith.constant 0 : i32
    return %arg0, %c0_i32, %c0_i32_0 : i32, i32, i32
  }
  func.func @transform_1(%arg0: i32) -> (i32, i32) {
    %c0_i32 = arith.constant 0 : i32
    %c0_i32_0 = arith.constant 0 : i32
    %c0_i32_1 = arith.constant 0 : i32
    return %c0_i32, %c0_i32_0 : i32, i32
  }
  func.func @transform_2(%arg0: i32) -> (i32, i32) {
    %c0_i32 = arith.constant 0 : i32
    %c0_i32_0 = arith.constant 0 : i32
    %c0_i32_1 = arith.constant 0 : i32
    return %c0_i32, %c0_i32_0 : i32, i32
  }
  func.func @transform_3(%arg0: i32) -> (i32, i32, i32, i32) {
    %c0_i32 = arith.constant 0 : i32
    %c0_i32_0 = arith.constant 0 : i32
    %c0_i32_1 = arith.constant 0 : i32
    %c0_i32_2 = arith.constant 0 : i32
    return %arg0, %c0_i32, %c0_i32_0, %c0_i32_1 : i32, i32, i32, i32
  }
}

</mosaic_0001>

<bundles_post_ra>
// kernel: tpu_custom_call.1
= control target key start
LH: loop header
LB: loop body
LE: loop exit
PB: predicated region body
PF: predicated region fallthrough
CT: control target
= control target key end

     0   :  { %6 = vsyncpa [#allocation3], 0  ;;  %s114_s0 = inlined_call_operand.hbm [shape: f32[8,128], index: 0, kind: input, shape index: {}]   ;;  %s115_s1 = inlined_call_operand.hbm [shape: f32[8,128], index: 1, kind: output, shape index: {}]  }
   0x1   :  { %7 = vsyncpa [#allocation4], 0  ;;  %s13_s8 = sshll.u32 %s114_s0, 4  ;;  %s96_s9 = smov [#allocation2]   ;;  %s14_s8 = int_to_ptr.hbm [resolvable:$true] %s13_s8 }
   0x2   :  { %s15_s10 = sshll.u32 %s96_s9, 4  ;;  %s16_s10 = int_to_ptr.vmem [resolvable:$true] %s15_s10 }
   0x3   :  { %18 = dma.hbm_to_vmem [thread:$0]  %s14_s8, 128, %s16_s10, [#allocation3]  }
   0x4   :  { %92 = dma.done.wait [#allocation3], 128  }
   0x5   :  { %93 = vsyncadd [#allocation3], 4294967168  ;;  %s97_s11 = smov [#allocation5]   ;;  %s32_s15 = sshll.u32 %s115_s1, 4  ;;  %v23_v0 = vld [vmem:[#allocation2] sm:$0xff]  ;;  %s33_s15 = int_to_ptr.hbm [resolvable:$true] %s32_s15 }
   0x6   :  { %s30_s12 = sshll.u32 %s97_s11, 4  ;;  %24 = vst [vmem:[#allocation5] sm:$0xff] %v23_v0  ;;  %s31_s12 = int_to_ptr.vmem [resolvable:$true] %s30_s12 }
   0x7   :  { %35 = dma.vmem_to_hbm [thread:$0]  %s31_s12, 128, %s33_s15, [#allocation4]  }
   0x8   :  { %94 = dma.done.wait [#allocation4], 128  }
   0x9   :  { %95 = vsyncadd [#allocation4], 4294967168 }
   0xa   :  { %40 = vsyncpa [#allocation3], 1 }
   0xb   :  { %41 = vsyncpa [#allocation4], 1 }

// kernel: mul.12
= control target key start
LH: loop header
LB: loop body
LE: loop exit
PB: predicated region body
PF: predicated region fallthrough
CT: control target
= control target key end

     0   :  { %s37_s8 = smov 16   ;;  %s38_s9 = smov 32   ;;  %vm7_vm0 = vcmask 130048   ;;  %vm13_vm1 = vcmask 523648   ;;  %vm19_vm2 = vcmask 392448   ;;  %vm25_vm3 = vcmask 261248   ;;  %s55_s0 = inlined_call_operand.vmem [shape: f32[4,16], index: 0, kind: input, shape index: {}]   ;;  %s56_s1 = inlined_call_operand.vmem [shape: f32[64], index: 1, kind: output, shape index: {}]  }
   0x1   :  { %v4_v0 = vld [vmem:[%s55_s0] sm:$0xf]  ;;  %s36_s0 = smov 48  }
   0x2   :  { %5 = vst [vmem:[#allocation1] sm:$0xf] %v4_v0 }
   0x9   :  { %v10_v1 = vld [vmem:[#allocation1 + $0x3] sm:$0x1]   ;;  %v22_v2 = vld [vmem:[#allocation1 + $0x1] sm:$0x1]   ;;  %v16_v3 = vld [vmem:[#allocation1 + $0x2] sm:$0x1]  }
   0xa   :  { %11 = vrot.lane.b32.xlu0 %v10_v1, %s36_s0  ;;  %23 = vrot.lane.b32.xlu1 %v22_v2, %s37_s8  ;;  %v6_v4 = vld [vmem:[#allocation1] sm:$0x1]  }
   0xb   :  { %8 = vst.msk [vmem:[#allocation0] sm:$0x1] %vm7_vm0, %v6_v4  }
  0x12   :  { %17 = vrot.lane.b32.xlu0 %v16_v3, %s38_s9 }
  0x7c   :  { %v12_v5 = vpop.permute.xlu0 %11   ;;  %v24_v6 = vpop.permute.xlu1 %23  }
  0x7d   :  { %14 = vst.msk [vmem:[#allocation0] sm:$0x1] %vm13_vm1, %v12_v5  }
  0x84   :  { %v18_v7 = vpop.permute.xlu0 %17  }
  0x85   :  { %20 = vst.msk [vmem:[#allocation0] sm:$0x1] %vm19_vm2, %v18_v7  }
  0x86   :  { %26 = vst.msk [vmem:[#allocation0] sm:$0x1] %vm25_vm3, %v24_v6  }
  0x8d   :  { %v29_v8 = vld [vmem:[#allocation0] sm:$0x1] }
  0x8e   :  { %32 = vst [vmem:[%s56_s1] sm:$0x1] %v29_v8 }

// kernel: _forward_impl.1
= control target key start
LH: loop header
LB: loop body
LE: loop exit
PB: predicated region body
PF: predicated region fallthrough
CT: control target
= control target key end

     0   :  { %vm83_vm0 = vcmask 64512   ;;  %vm549_vm1 = vcmask 261120   ;;  %s1072_s5 = smov 96   ;;  %s2137_s1 = inlined_call_operand.vmem [shape: f32[8,64], index: 1, kind: input, shape index: {}]   ;;  %s2138_s0 = inlined_call_operand.vmem [shape: f32[32,16,8], index: 0, kind: input, shape index: {}]   ;;  %s2139_s2 = inlined_call_operand.vmem [shape: f32[1,64], index: 2, kind: input, shape index: {}]   ;;  %s2140_s3 = inlined_call_operand.vmem [shape: f32[32,2,16,32], index: 3, kind: output, shape index: {}]  }
   0x1   :  { %v78_v0 = vld [vmem:[%s2137_s1] sm:$0xff]  ;;  %v15_v5 = vld [vmem:[%s2138_s0 + $0x8] sm:$0xff]  ;;  %v16_v9 = vld [vmem:[%s2138_s0 + $0x10] sm:$0xff] }
   0x2   :  { %v14_v1 = vld [vmem:[%s2138_s0] sm:$0xff]  ;;  %291 = vmatpush.msra.mxu0 %v78_v0  ;;  %1068 = vmatpush.msra.mxu2 %v78_v0  ;;  %v47_v6 = vld [vmem:[%s2138_s0 + $0x108] sm:$0xff]  ;;  %v48_v10 = vld [vmem:[%s2138_s0 + $0x110] sm:$0xff] }
   0x3   :  { %v46_v2 = vld [vmem:[%s2138_s0 + $0x100] sm:$0xff]  ;;  %1069 = vmatpush.msra.mxu3 %v78_v0  ;;  %939 = vmatmul.msk.f32.vlgmr.msra.gmra.mxu0 %vm83_vm0, %v14_v1  ;;  %v63_v7 = vld [vmem:[%s2138_s0 + $0x188] sm:$0xff]  ;;  %v64_v11 = vld [vmem:[%s2138_s0 + $0x190] sm:$0xff] }
   0x4   :  { %v62_v3 = vld [vmem:[%s2138_s0 + $0x180] sm:$0xff]  ;;  %971 = vmatmul.msk.f32.vlgmr.msra.gmra.mxu2 %vm83_vm0, %v46_v2  ;;  %1067 = vmatpush.msra.mxu1 %v78_v0  ;;  %v31_v8 = vld [vmem:[%s2138_s0 + $0x88] sm:$0xff]  ;;  %v32_v12 = vld [vmem:[%s2138_s0 + $0x90] sm:$0xff] }
   0x5   :  { %v30_v4 = vld [vmem:[%s2138_s0 + $0x80] sm:$0xff]  ;;  %987 = vmatmul.msk.f32.vlgmr.msra.gmra.mxu3 %vm83_vm0, %v62_v3  ;;  %v17_v13 = vld [vmem:[%s2138_s0 + $0x18] sm:$0xff]  ;;  %v19_v21 = vld [vmem:[%s2138_s0 + $0x28] sm:$0xff] }
   0x6   :  { %955 = vmatmul.msk.f32.vlgmr.msra.gmra.mxu1 %vm83_vm0, %v30_v4  ;;  %v49_v14 = vld [vmem:[%s2138_s0 + $0x118] sm:$0xff]  ;;  %v18_v17 = vld [vmem:[%s2138_s0 + $0x20] sm:$0xff]  ;;  %v51_v22 = vld [vmem:[%s2138_s0 + $0x128] sm:$0xff] }
   0x7   :  { %v65_v15 = vld [vmem:[%s2138_s0 + $0x198] sm:$0xff]  ;;  %v50_v18 = vld [vmem:[%s2138_s0 + $0x120] sm:$0xff]  ;;  %v67_v23 = vld [vmem:[%s2138_s0 + $0x1a8] sm:$0xff] }
   0x8   :  { %v33_v16 = vld [vmem:[%s2138_s0 + $0x98] sm:$0xff]  ;;  %v66_v19 = vld [vmem:[%s2138_s0 + $0x1a0] sm:$0xff]  ;;  %v35_v24 = vld [vmem:[%s2138_s0 + $0xa8] sm:$0xff] }
   0x9   :  { %v34_v20 = vld [vmem:[%s2138_s0 + $0xa0] sm:$0xff]  ;;  %v20_v25 = vld [vmem:[%s2138_s0 + $0x30] sm:$0xff]  ;;  %v21_v29 = vld [vmem:[%s2138_s0 + $0x38] sm:$0xff] }
   0xa   :  { %v52_v26 = vld [vmem:[%s2138_s0 + $0x130] sm:$0xff]  ;;  %v53_v30 = vld [vmem:[%s2138_s0 + $0x138] sm:$0xff]  ;;  %v22_v33 = vld [vmem:[%s2138_s0 + $0x40] sm:$0xff] }
   0xb   :  { %940 = vmatmul.msk.f32.gmra.mxu0 %vm83_vm0, %v15_v5  ;;  %v68_v27 = vld [vmem:[%s2138_s0 + $0x1b0] sm:$0xff]  ;;  %v69_v31 = vld [vmem:[%s2138_s0 + $0x1b8] sm:$0xff]  ;;  %v54_v34 = vld [vmem:[%s2138_s0 + $0x140] sm:$0xff] }
   0xc   :  { %972 = vmatmul.msk.f32.gmra.mxu2 %vm83_vm0, %v47_v6  ;;  %v36_v28 = vld [vmem:[%s2138_s0 + $0xb0] sm:$0xff]  ;;  %v37_v32 = vld [vmem:[%s2138_s0 + $0xb8] sm:$0xff]  ;;  %v70_v35 = vld [vmem:[%s2138_s0 + $0x1c0] sm:$0xff] }
   0xd   :  { %988 = vmatmul.msk.f32.gmra.mxu3 %vm83_vm0, %v63_v7  ;;  %v38_v36 = vld [vmem:[%s2138_s0 + $0xc0] sm:$0xff]  ;;  %v23_v37 = vld [vmem:[%s2138_s0 + $0x48] sm:$0xff]  ;;  %v24_v41 = vld [vmem:[%s2138_s0 + $0x50] sm:$0xff] }
   0xe   :  { %956 = vmatmul.msk.f32.gmra.mxu1 %vm83_vm0, %v31_v8  ;;  %v55_v38 = vld [vmem:[%s2138_s0 + $0x148] sm:$0xff]  ;;  %v56_v42 = vld [vmem:[%s2138_s0 + $0x150] sm:$0xff]  ;;  %v25_v45 = vld [vmem:[%s2138_s0 + $0x58] sm:$0xff] }
   0xf   :  { %v71_v39 = vld [vmem:[%s2138_s0 + $0x1c8] sm:$0xff]  ;;  %v72_v43 = vld [vmem:[%s2138_s0 + $0x1d0] sm:$0xff]  ;;  %v57_v46 = vld [vmem:[%s2138_s0 + $0x158] sm:$0xff] }
  0x10   :  { %v39_v40 = vld [vmem:[%s2138_s0 + $0xc8] sm:$0xff]  ;;  %v40_v44 = vld [vmem:[%s2138_s0 + $0xd0] sm:$0xff]  ;;  %v73_v47 = vld [vmem:[%s2138_s0 + $0x1d8] sm:$0xff] }
  0x11   :  { %v41_v48 = vld [vmem:[%s2138_s0 + $0xd8] sm:$0xff]  ;;  %v26_v49 = vld [vmem:[%s2138_s0 + $0x60] sm:$0xff]  ;;  %v59_v53 = vld [vmem:[%s2138_s0 + $0x168] sm:$0xff] }
  0x12   :  { %v58_v50 = vld [vmem:[%s2138_s0 + $0x160] sm:$0xff]  ;;  %v27_v54 = vld [vmem:[%s2138_s0 + $0x68] sm:$0xff]  ;;  %v60_v56 = vld [vmem:[%s2138_s0 + $0x170] sm:$0xff] }
  0x13   :  { %941 = vmatmul.msk.f32.gmra.mxu0 %vm83_vm0, %v16_v9  ;;  %v74_v51 = vld [vmem:[%s2138_s0 + $0x1e0] sm:$0xff]  ;;  %v43_v55 = vld [vmem:[%s2138_s0 + $0xe8] sm:$0xff]  ;;  %v28_v58 = vld [vmem:[%s2138_s0 + $0x70] sm:$0xff] }
  0x14   :  { %973 = vmatmul.msk.f32.gmra.mxu2 %vm83_vm0, %v48_v10  ;;  %v42_v52 = vld [vmem:[%s2138_s0 + $0xe0] sm:$0xff]  ;;  %v75_v57 = vld [vmem:[%s2138_s0 + $0x1e8] sm:$0xff]  ;;  %v44_v59 = vld [vmem:[%s2138_s0 + $0xf0] sm:$0xff] }
  0x15   :  { %989 = vmatmul.msk.f32.gmra.mxu3 %vm83_vm0, %v64_v11  ;;  %v61_v60 = vld [vmem:[%s2138_s0 + $0x178] sm:$0xff]  ;;  %v1339_v61 = vld [vmem:[%s2139_s2] ss:$0 sm:$0xff]  ;;  %v76_v62 = vld [vmem:[%s2138_s0 + $0x1f0] sm:$0xff] }
  0x16   :  { %957 = vmatmul.msk.f32.gmra.mxu1 %vm83_vm0, %v32_v12  ;;  %v45_v1 = vld [vmem:[%s2138_s0 + $0xf8] sm:$0xff] }
  0x17   :  { %v29_v4 = vld [vmem:[%s2138_s0 + $0x78] sm:$0xff] }
  0x18   :  { %v77_v6 = vld [vmem:[%s2138_s0 + $0x1f8] sm:$0xff] }
  0x1b   :  { %942 = vmatmul.msk.f32.gmra.mxu0 %vm83_vm0, %v17_v13 }
  0x1c   :  { %974 = vmatmul.msk.f32.gmra.mxu2 %vm83_vm0, %v49_v14 }
  0x1d   :  { %990 = vmatmul.msk.f32.gmra.mxu3 %vm83_vm0, %v65_v15 }
  0x1e   :  { %958 = vmatmul.msk.f32.gmra.mxu1 %vm83_vm0, %v33_v16 }
  0x23   :  { %943 = vmatmul.msk.f32.gmra.mxu0 %vm83_vm0, %v18_v17 }
  0x24   :  { %975 = vmatmul.msk.f32.gmra.mxu2 %vm83_vm0, %v50_v18 }
  0x25   :  { %991 = vmatmul.msk.f32.gmra.mxu3 %vm83_vm0, %v66_v19 }
  0x26   :  { %959 = vmatmul.msk.f32.gmra.mxu1 %vm83_vm0, %v34_v20 }
  0x2b   :  { %944 = vmatmul.msk.f32.gmra.mxu0 %vm83_vm0, %v19_v21 }
  0x2c   :  { %976 = vmatmul.msk.f32.gmra.mxu2 %vm83_vm0, %v51_v22 }
  0x2d   :  { %992 = vmatmul.msk.f32.gmra.mxu3 %vm83_vm0, %v67_v23 }
  0x2e   :  { %960 = vmatmul.msk.f32.gmra.mxu1 %vm83_vm0, %v35_v24 }
  0x33   :  { %945 = vmatmul.msk.f32.gmra.mxu0 %vm83_vm0, %v20_v25 }
  0x34   :  { %977 = vmatmul.msk.f32.gmra.mxu2 %vm83_vm0, %v52_v26 }
  0x35   :  { %993 = vmatmul.msk.f32.gmra.mxu3 %vm83_vm0, %v68_v27 }
  0x36   :  { %961 = vmatmul.msk.f32.gmra.mxu1 %vm83_vm0, %v36_v28 }
  0x3b   :  { %946 = vmatmul.msk.f32.gmra.mxu0 %vm83_vm0, %v21_v29 }
  0x3c   :  { %978 = vmatmul.msk.f32.gmra.mxu2 %vm83_vm0, %v53_v30 }
  0x3d   :  { %994 = vmatmul.msk.f32.gmra.mxu3 %vm83_vm0, %v69_v31 }
  0x3e   :  { %962 = vmatmul.msk.f32.gmra.mxu1 %vm83_vm0, %v37_v32 }
  0x43   :  { %947 = vmatmul.msk.f32.gmra.mxu0 %vm83_vm0, %v22_v33 }
  0x44   :  { %979 = vmatmul.msk.f32.gmra.mxu2 %vm83_vm0, %v54_v34 }
  0x45   :  { %995 = vmatmul.msk.f32.gmra.mxu3 %vm83_vm0, %v70_v35 }
  0x46   :  { %963 = vmatmul.msk.f32.gmra.mxu1 %vm83_vm0, %v38_v36 }
  0x4b   :  { %948 = vmatmul.msk.f32.gmra.mxu0 %vm83_vm0, %v23_v37 }
  0x4c   :  { %980 = vmatmul.msk.f32.gmra.mxu2 %vm83_vm0, %v55_v38 }
  0x4d   :  { %996 = vmatmul.msk.f32.gmra.mxu3 %vm83_vm0, %v71_v39 }
  0x4e   :  { %964 = vmatmul.msk.f32.gmra.mxu1 %vm83_vm0, %v39_v40 }
  0x53   :  { %949 = vmatmul.msk.f32.gmra.mxu0 %vm83_vm0, %v24_v41 }
  0x54   :  { %981 = vmatmul.msk.f32.gmra.mxu2 %vm83_vm0, %v56_v42 }
  0x55   :  { %997 = vmatmul.msk.f32.gmra.mxu3 %vm83_vm0, %v72_v43 }
  0x56   :  { %965 = vmatmul.msk.f32.gmra.mxu1 %vm83_vm0, %v40_v44 }
  0x5b   :  { %950 = vmatmul.msk.f32.gmra.mxu0 %vm83_vm0, %v25_v45 }
  0x5c   :  { %982 = vmatmul.msk.f32.gmra.mxu2 %vm83_vm0, %v57_v46 }
  0x5d   :  { %998 = vmatmul.msk.f32.gmra.mxu3 %vm83_vm0, %v73_v47 }
  0x5e   :  { %966 = vmatmul.msk.f32.gmra.mxu1 %vm83_vm0, %v41_v48 }
  0x63   :  { %951 = vmatmul.msk.f32.gmra.mxu0 %vm83_vm0, %v26_v49 }
  0x64   :  { %983 = vmatmul.msk.f32.gmra.mxu2 %vm83_vm0, %v58_v50 }
  0x65   :  { %999 = vmatmul.msk.f32.gmra.mxu3 %vm83_vm0, %v74_v51 }
  0x66   :  { %967 = vmatmul.msk.f32.gmra.mxu1 %vm83_vm0, %v42_v52 }
  0x6b   :  { %952 = vmatmul.msk.f32.gmra.mxu0 %vm83_vm0, %v27_v54 }
  0x6c   :  { %984 = vmatmul.msk.f32.gmra.mxu2 %vm83_vm0, %v59_v53 }
  0x6d   :  { %1000 = vmatmul.msk.f32.gmra.mxu3 %vm83_vm0, %v75_v57 }
  0x6e   :  { %968 = vmatmul.msk.f32.gmra.mxu1 %vm83_vm0, %v43_v55 }
  0x73   :  { %953 = vmatmul.msk.f32.gmra.mxu0 %vm83_vm0, %v28_v58 }
  0x74   :  { %985 = vmatmul.msk.f32.gmra.mxu2 %vm83_vm0, %v60_v56 }
  0x75   :  { %1001 = vmatmul.msk.f32.gmra.mxu3 %vm83_vm0, %v76_v62 }
  0x76   :  { %969 = vmatmul.msk.f32.gmra.mxu1 %vm83_vm0, %v44_v59 }
  0x7b   :  { %954 = vmatmul.msk.f32.gmra.mxu0 %vm83_vm0, %v29_v4 }
  0x7c   :  { %986 = vmatmul.msk.f32.gmra.mxu2 %vm83_vm0, %v61_v60 }
  0x7d   :  { %1002 = vmatmul.msk.f32.gmra.mxu3 %vm83_vm0, %v77_v6 }
  0x7e   :  { %970 = vmatmul.msk.f32.gmra.mxu1 %vm83_vm0, %v45_v1 }
  0x80   :  { %v293_v63 = vpop.f32.mrf.mxu0 }
  0x81   :  { %v294_v0 = vadd.f32 %v1339_v61, %v293_v63 }
  0x83   :  { %v485_v2 = vmax.f32 %v294_v0, 0.0  ;;  %v341_v3 = vpop.f32.mrf.mxu1 }
  0x84   :  { %v342_v5 = vadd.f32 %v1339_v61, %v341_v3 }
  0x85   :  { %550 = vst.msk [vmem:[%s2140_s3] sm:$0xff] %vm549_vm1, %v485_v2  ;;  %678 = vrot.lane.b32.xlu0 %v485_v2, %s1072_s5 }
  0x86   :  { %v501_v7 = vmax.f32 %v342_v5, 0.0 }
  0x87   :  { %v389_v8 = vpop.f32.mrf.mxu2 }
  0x88   :  { %v437_v9 = vpop.f32.mrf.mxu3  ;;  %566 = vst.msk [vmem:[%s2140_s3 + $0x100] sm:$0xff] %vm549_vm1, %v501_v7  ;;  %v390_v10 = vadd.f32 %v1339_v61, %v389_v8  ;;  %710 = vrot.lane.b32.xlu1 %v501_v7, %s1072_s5  ;;  %v296_v12 = vpop.f32.mrf.mxu0 }
  0x89   :  { %v438_v11 = vadd.f32 %v1339_v61, %v437_v9  ;;  %v297_v13 = vadd.f32 %v1339_v61, %v296_v12 }
  0x8a   :  { %v517_v14 = vmax.f32 %v390_v10, 0.0 }
  0x8b   :  { %v533_v15 = vmax.f32 %v438_v11, 0.0  ;;  %v486_v16 = vmax.f32 %v297_v13, 0.0  ;;  %v344_v17 = vpop.f32.mrf.mxu1 }
  0x8c   :  { %582 = vst.msk [vmem:[%s2140_s3 + $0x200] sm:$0xff] %vm549_vm1, %v517_v14  ;;  %742 = vrot.lane.b32.xlu2 %v517_v14, %s1072_s5  ;;  %v345_v18 = vadd.f32 %v1339_v61, %v344_v17 }
  0x8d   :  { %598 = vst.msk [vmem:[%s2140_s3 + $0x300] sm:$0xff] %vm549_vm1, %v533_v15  ;;  %774 = vrot.lane.b32.xlu0 %v533_v15, %s1072_s5 }
  0x8e   :  { %551 = vst.msk [vmem:[%s2140_s3 + $0x8] sm:$0xff] %vm549_vm1, %v486_v16  ;;  %v502_v19 = vmax.f32 %v345_v18, 0.0 }
  0x8f   :  { %v392_v20 = vpop.f32.mrf.mxu2 }
  0x90   :  { %v440_v21 = vpop.f32.mrf.mxu3  ;;  %567 = vst.msk [vmem:[%s2140_s3 + $0x108] sm:$0xff] %vm549_vm1, %v502_v19  ;;  %v393_v22 = vadd.f32 %v1339_v61, %v392_v20  ;;  %v299_v24 = vpop.f32.mrf.mxu0 }
  0x91   :  { %v441_v23 = vadd.f32 %v1339_v61, %v440_v21  ;;  %v300_v25 = vadd.f32 %v1339_v61, %v299_v24 }
  0x92   :  { %v518_v26 = vmax.f32 %v393_v22, 0.0 }
  0x93   :  { %v534_v27 = vmax.f32 %v441_v23, 0.0  ;;  %v347_v28 = vpop.f32.mrf.mxu1  ;;  %v487_v29 = vmax.f32 %v300_v25, 0.0 }
  0x94   :  { %583 = vst.msk [vmem:[%s2140_s3 + $0x208] sm:$0xff] %vm549_vm1, %v518_v26  ;;  %712 = vrot.lane.b32.xlu2 %v502_v19, %s1072_s5  ;;  %v348_v30 = vadd.f32 %v1339_v61, %v347_v28 }
  0x95   :  { %776 = vrot.lane.b32.xlu1 %v534_v27, %s1072_s5  ;;  %599 = vst.msk [vmem:[%s2140_s3 + $0x308] sm:$0xff] %vm549_vm1, %v534_v27  ;;  %680 = vrot.lane.b32.xlu0 %v486_v16, %s1072_s5 }
  0x96   :  { %552 = vst.msk [vmem:[%s2140_s3 + $0x20] sm:$0xff] %vm549_vm1, %v487_v29  ;;  %v503_v31 = vmax.f32 %v348_v30, 0.0 }
  0x97   :  { %v395_v32 = vpop.f32.mrf.mxu2 }
  0x98   :  { %v443_v33 = vpop.f32.mrf.mxu3  ;;  %v396_v34 = vadd.f32 %v1339_v61, %v395_v32  ;;  %v302_v36 = vpop.f32.mrf.mxu0  ;;  %568 = vst.msk [vmem:[%s2140_s3 + $0x120] sm:$0xff] %vm549_vm1, %v503_v31 }
  0x99   :  { %v444_v35 = vadd.f32 %v1339_v61, %v443_v33  ;;  %v303_v37 = vadd.f32 %v1339_v61, %v302_v36 }
  0x9a   :  { %v519_v38 = vmax.f32 %v396_v34, 0.0 }
  0x9b   :  { %v535_v39 = vmax.f32 %v444_v35, 0.0  ;;  %v350_v40 = vpop.f32.mrf.mxu1  ;;  %v488_v41 = vmax.f32 %v303_v37, 0.0 }
  0x9c   :  { %584 = vst.msk [vmem:[%s2140_s3 + $0x220] sm:$0xff] %vm549_vm1, %v519_v38  ;;  %v351_v42 = vadd.f32 %v1339_v61, %v350_v40 }
  0x9d   :  { %778 = vrot.lane.b32.xlu2 %v535_v39, %s1072_s5  ;;  %682 = vrot.lane.b32.xlu1 %v487_v29, %s1072_s5  ;;  %600 = vst.msk [vmem:[%s2140_s3 + $0x320] sm:$0xff] %vm549_vm1, %v535_v39 }
  0x9e   :  { %744 = vrot.lane.b32.xlu0 %v518_v26, %s1072_s5  ;;  %553 = vst.msk [vmem:[%s2140_s3 + $0x28] sm:$0xff] %vm549_vm1, %v488_v41  ;;  %v504_v43 = vmax.f32 %v351_v42, 0.0 }
  0x9f   :  { %v398_v44 = vpop.f32.mrf.mxu2 }
  0xa0   :  { %v446_v45 = vpop.f32.mrf.mxu3  ;;  %v399_v46 = vadd.f32 %v1339_v61, %v398_v44  ;;  %v305_v47 = vpop.f32.mrf.mxu0  ;;  %569 = vst.msk [vmem:[%s2140_s3 + $0x128] sm:$0xff] %vm549_vm1, %v504_v43 }
  0xa1   :  { %v447_v48 = vadd.f32 %v1339_v61, %v446_v45  ;;  %v306_v49 = vadd.f32 %v1339_v61, %v305_v47 }
  0xa2   :  { %v520_v50 = vmax.f32 %v399_v46, 0.0 }
  0xa3   :  { %v536_v51 = vmax.f32 %v447_v48, 0.0  ;;  %v489_v52 = vmax.f32 %v306_v49, 0.0  ;;  %v353_v53 = vpop.f32.mrf.mxu1 }
  0xa4   :  { %585 = vst.msk [vmem:[%s2140_s3 + $0x228] sm:$0xff] %vm549_vm1, %v520_v50  ;;  %v354_v54 = vadd.f32 %v1339_v61, %v353_v53 }
  0xa5   :  { %748 = vrot.lane.b32.xlu2 %v520_v50, %s1072_s5  ;;  %746 = vrot.lane.b32.xlu1 %v519_v38, %s1072_s5  ;;  %554 = vst.msk [vmem:[%s2140_s3 + $0x40] sm:$0xff] %vm549_vm1, %v489_v52 }
  0xa6   :  { %714 = vrot.lane.b32.xlu0 %v503_v31, %s1072_s5  ;;  %601 = vst.msk [vmem:[%s2140_s3 + $0x328] sm:$0xff] %vm549_vm1, %v536_v51  ;;  %v505_v55 = vmax.f32 %v354_v54, 0.0 }
  0xa7   :  { %v401_v56 = vpop.f32.mrf.mxu2 }
  0xa8   :  { %v449_v57 = vpop.f32.mrf.mxu3  ;;  %570 = vst.msk [vmem:[%s2140_s3 + $0x140] sm:$0xff] %vm549_vm1, %v505_v55  ;;  %v402_v58 = vadd.f32 %v1339_v61, %v401_v56  ;;  %v308_v59 = vpop.f32.mrf.mxu0 }
  0xa9   :  { %v450_v60 = vadd.f32 %v1339_v61, %v449_v57  ;;  %v309_v62 = vadd.f32 %v1339_v61, %v308_v59 }
  0xaa   :  { %v521_v63 = vmax.f32 %v402_v58, 0.0 }
  0xab   :  { %v490_v0 = vmax.f32 %v309_v62, 0.0  ;;  %v356_v1 = vpop.f32.mrf.mxu1  ;;  %v537_v2 = vmax.f32 %v450_v60, 0.0 }
  0xac   :  { %586 = vst.msk [vmem:[%s2140_s3 + $0x240] sm:$0xff] %vm549_vm1, %v521_v63  ;;  %v357_v3 = vadd.f32 %v1339_v61, %v356_v1 }
  0xad   :  { %686 = vrot.lane.b32.xlu2 %v489_v52, %s1072_s5  ;;  %684 = vrot.lane.b32.xlu1 %v488_v41, %s1072_s5  ;;  %555 = vst.msk [vmem:[%s2140_s3 + $0x48] sm:$0xff] %vm549_vm1, %v490_v0 }
  0xae   :  { %780 = vrot.lane.b32.xlu0 %v536_v51, %s1072_s5  ;;  %602 = vst.msk [vmem:[%s2140_s3 + $0x340] sm:$0xff] %vm549_vm1, %v537_v2  ;;  %v506_v4 = vmax.f32 %v357_v3, 0.0 }
  0xaf   :  { %v404_v5 = vpop.f32.mrf.mxu2 }
  0xb0   :  { %v452_v6 = vpop.f32.mrf.mxu3  ;;  %571 = vst.msk [vmem:[%s2140_s3 + $0x148] sm:$0xff] %vm549_vm1, %v506_v4  ;;  %v405_v7 = vadd.f32 %v1339_v61, %v404_v5  ;;  %v311_v9 = vpop.f32.mrf.mxu0 }
  0xb1   :  { %v453_v8 = vadd.f32 %v1339_v61, %v452_v6  ;;  %v312_v10 = vadd.f32 %v1339_v61, %v311_v9 }
  0xb2   :  { %v522_v11 = vmax.f32 %v405_v7, 0.0 }
  0xb3   :  { %v538_v12 = vmax.f32 %v453_v8, 0.0  ;;  %v491_v13 = vmax.f32 %v312_v10, 0.0  ;;  %v359_v14 = vpop.f32.mrf.mxu1 }
  0xb4   :  { %587 = vst.msk [vmem:[%s2140_s3 + $0x248] sm:$0xff] %vm549_vm1, %v522_v11  ;;  %v360_v15 = vadd.f32 %v1339_v61, %v359_v14 }
  0xb5   :  { %718 = vrot.lane.b32.xlu2 %v505_v55, %s1072_s5  ;;  %716 = vrot.lane.b32.xlu1 %v504_v43, %s1072_s5  ;;  %603 = vst.msk [vmem:[%s2140_s3 + $0x348] sm:$0xff] %vm549_vm1, %v538_v12 }
  0xb6   :  { %750 = vrot.lane.b32.xlu0 %v521_v63, %s1072_s5  ;;  %556 = vst.msk [vmem:[%s2140_s3 + $0x60] sm:$0xff] %vm549_vm1, %v491_v13  ;;  %v507_v16 = vmax.f32 %v360_v15, 0.0 }
  0xb7   :  { %v407_v17 = vpop.f32.mrf.mxu2 }
  0xb8   :  { %v455_v18 = vpop.f32.mrf.mxu3  ;;  %572 = vst.msk [vmem:[%s2140_s3 + $0x160] sm:$0xff] %vm549_vm1, %v507_v16  ;;  %v408_v19 = vadd.f32 %v1339_v61, %v407_v17  ;;  %v314_v21 = vpop.f32.mrf.mxu0 }
  0xb9   :  { %v456_v20 = vadd.f32 %v1339_v61, %v455_v18  ;;  %v315_v22 = vadd.f32 %v1339_v61, %v314_v21 }
  0xba   :  { %v523_v23 = vmax.f32 %v408_v19, 0.0 }
  0xbb   :  { %v539_v24 = vmax.f32 %v456_v20, 0.0  ;;  %v362_v25 = vpop.f32.mrf.mxu1  ;;  %v492_v26 = vmax.f32 %v315_v22, 0.0 }
  0xbc   :  { %588 = vst.msk [vmem:[%s2140_s3 + $0x260] sm:$0xff] %vm549_vm1, %v523_v23  ;;  %v363_v27 = vadd.f32 %v1339_v61, %v362_v25 }
  0xbd   :  { %688 = vrot.lane.b32.xlu2 %v490_v0, %s1072_s5  ;;  %782 = vrot.lane.b32.xlu1 %v537_v2, %s1072_s5  ;;  %604 = vst.msk [vmem:[%s2140_s3 + $0x360] sm:$0xff] %vm549_vm1, %v539_v24 }
  0xbe   :  { %720 = vrot.lane.b32.xlu0 %v506_v4, %s1072_s5  ;;  %557 = vst.msk [vmem:[%s2140_s3 + $0x68] sm:$0xff] %vm549_vm1, %v492_v26  ;;  %v508_v28 = vmax.f32 %v363_v27, 0.0 }
  0xbf   :  { %v410_v29 = vpop.f32.mrf.mxu2 }
  0xc0   :  { %v458_v30 = vpop.f32.mrf.mxu3  ;;  %573 = vst.msk [vmem:[%s2140_s3 + $0x168] sm:$0xff] %vm549_vm1, %v508_v28  ;;  %v411_v31 = vadd.f32 %v1339_v61, %v410_v29  ;;  %v317_v32 = vpop.f32.mrf.mxu0 }
  0xc1   :  { %v1531_v33 = vadd.f32 %v1339_v61, %v458_v30  ;;  %v318_v34 = vadd.f32 %v1339_v61, %v317_v32 }
  0xc2   :  { %v524_v35 = vmax.f32 %v411_v31, 0.0 }
  0xc3   :  { %v493_v36 = vmax.f32 %v318_v34, 0.0  ;;  %v365_v37 = vpop.f32.mrf.mxu1  ;;  %v540_v38 = vmax.f32 %v1531_v33, 0.0 }
  0xc4   :  { %589 = vst.msk [vmem:[%s2140_s3 + $0x268] sm:$0xff] %vm549_vm1, %v524_v35  ;;  %v366_v39 = vadd.f32 %v1339_v61, %v365_v37 }
  0xc5   :  { %784 = vrot.lane.b32.xlu2 %v538_v12, %s1072_s5  ;;  %752 = vrot.lane.b32.xlu1 %v522_v11, %s1072_s5  ;;  %558 = vst.msk [vmem:[%s2140_s3 + $0x80] sm:$0xff] %vm549_vm1, %v493_v36 }
  0xc6   :  { %690 = vrot.lane.b32.xlu0 %v491_v13, %s1072_s5  ;;  %605 = vst.msk [vmem:[%s2140_s3 + $0x368] sm:$0xff] %vm549_vm1, %v540_v38  ;;  %v509_v40 = vmax.f32 %v366_v39, 0.0 }
  0xc7   :  { %v413_v41 = vpop.f32.mrf.mxu2 }
  0xc8   :  { %v461_v42 = vpop.f32.mrf.mxu3  ;;  %574 = vst.msk [vmem:[%s2140_s3 + $0x180] sm:$0xff] %vm549_vm1, %v509_v40  ;;  %v1556_v43 = vadd.f32 %v1339_v61, %v413_v41  ;;  %v320_v45 = vpop.f32.mrf.mxu0 }
  0xc9   :  { %v462_v44 = vadd.f32 %v1339_v61, %v461_v42  ;;  %v1560_v46 = vadd.f32 %v1339_v61, %v320_v45 }
  0xca   :  { %v525_v47 = vmax.f32 %v1556_v43, 0.0 }
  0xcb   :  { %v541_v48 = vmax.f32 %v462_v44, 0.0  ;;  %v494_v49 = vmax.f32 %v1560_v46, 0.0  ;;  %v368_v50 = vpop.f32.mrf.mxu1 }
  0xcc   :  { %590 = vst.msk [vmem:[%s2140_s3 + $0x280] sm:$0xff] %vm549_vm1, %v525_v47  ;;  %v1571_v51 = vadd.f32 %v1339_v61, %v368_v50 }
  0xcd   :  { %754 = vrot.lane.b32.xlu2 %v523_v23, %s1072_s5  ;;  %722 = vrot.lane.b32.xlu1 %v507_v16, %s1072_s5  ;;  %606 = vst.msk [vmem:[%s2140_s3 + $0x380] sm:$0xff] %vm549_vm1, %v541_v48 }
  0xce   :  { %786 = vrot.lane.b32.xlu0 %v539_v24, %s1072_s5  ;;  %559 = vst.msk [vmem:[%s2140_s3 + $0x88] sm:$0xff] %vm549_vm1, %v494_v49  ;;  %v510_v52 = vmax.f32 %v1571_v51, 0.0 }
  0xcf   :  { %v416_v53 = vpop.f32.mrf.mxu2 }
  0xd0   :  { %v464_v54 = vpop.f32.mrf.mxu3  ;;  %575 = vst.msk [vmem:[%s2140_s3 + $0x188] sm:$0xff] %vm549_vm1, %v510_v52  ;;  %v417_v55 = vadd.f32 %v1339_v61, %v416_v53  ;;  %v323_v57 = vpop.f32.mrf.mxu0 }
  0xd1   :  { %v1591_v56 = vadd.f32 %v1339_v61, %v464_v54  ;;  %v1594_v58 = vadd.f32 %v1339_v61, %v323_v57 }
  0xd2   :  { %v526_v59 = vmax.f32 %v417_v55, 0.0 }
  0xd3   :  { %v542_v60 = vmax.f32 %v1591_v56, 0.0  ;;  %v371_v62 = vpop.f32.mrf.mxu1  ;;  %v495_v63 = vmax.f32 %v1594_v58, 0.0 }
  0xd4   :  { %591 = vst.msk [vmem:[%s2140_s3 + $0x288] sm:$0xff] %vm549_vm1, %v526_v59  ;;  %v1605_v0 = vadd.f32 %v1339_v61, %v371_v62 }
  0xd5   :  { %724 = vrot.lane.b32.xlu2 %v508_v28, %s1072_s5  ;;  %692 = vrot.lane.b32.xlu1 %v492_v26, %s1072_s5  ;;  %607 = vst.msk [vmem:[%s2140_s3 + $0x388] sm:$0xff] %vm549_vm1, %v542_v60 }
  0xd6   :  { %756 = vrot.lane.b32.xlu0 %v524_v35, %s1072_s5  ;;  %560 = vst.msk [vmem:[%s2140_s3 + $0xa0] sm:$0xff] %vm549_vm1, %v495_v63  ;;  %v511_v1 = vmax.f32 %v1605_v0, 0.0 }
  0xd7   :  { %v419_v2 = vpop.f32.mrf.mxu2 }
  0xd8   :  { %v467_v3 = vpop.f32.mrf.mxu3  ;;  %576 = vst.msk [vmem:[%s2140_s3 + $0x1a0] sm:$0xff] %vm549_vm1, %v511_v1  ;;  %v1626_v4 = vadd.f32 %v1339_v61, %v419_v2  ;;  %v326_v5 = vpop.f32.mrf.mxu0 }
  0xd9   :  { %v1629_v6 = vadd.f32 %v1339_v61, %v467_v3  ;;  %v1632_v7 = vadd.f32 %v1339_v61, %v326_v5 }
  0xda   :  { %v527_v8 = vmax.f32 %v1626_v4, 0.0 }
  0xdb   :  { %v496_v9 = vmax.f32 %v1632_v7, 0.0  ;;  %v374_v10 = vpop.f32.mrf.mxu1  ;;  %v543_v11 = vmax.f32 %v1629_v6, 0.0 }
  0xdc   :  { %592 = vst.msk [vmem:[%s2140_s3 + $0x2a0] sm:$0xff] %vm549_vm1, %v527_v8  ;;  %v1644_v12 = vadd.f32 %v1339_v61, %v374_v10 }
  0xdd   :  { %694 = vrot.lane.b32.xlu2 %v493_v36, %s1072_s5  ;;  %788 = vrot.lane.b32.xlu1 %v540_v38, %s1072_s5  ;;  %561 = vst.msk [vmem:[%s2140_s3 + $0xa8] sm:$0xff] %vm549_vm1, %v496_v9 }
  0xde   :  { %726 = vrot.lane.b32.xlu0 %v509_v40, %s1072_s5  ;;  %608 = vst.msk [vmem:[%s2140_s3 + $0x3a0] sm:$0xff] %vm549_vm1, %v543_v11  ;;  %v512_v13 = vmax.f32 %v1644_v12, 0.0 }
  0xdf   :  { %v422_v14 = vpop.f32.mrf.mxu2 }
  0xe0   :  { %v470_v15 = vpop.f32.mrf.mxu3  ;;  %577 = vst.msk [vmem:[%s2140_s3 + $0x1a8] sm:$0xff] %vm549_vm1, %v512_v13  ;;  %v1667_v16 = vadd.f32 %v1339_v61, %v422_v14  ;;  %v329_v18 = vpop.f32.mrf.mxu0 }
  0xe1   :  { %v1670_v17 = vadd.f32 %v1339_v61, %v470_v15  ;;  %v1674_v20 = vadd.f32 %v1339_v61, %v329_v18 }
  0xe2   :  { %v528_v19 = vmax.f32 %v1667_v16, 0.0 }
  0xe3   :  { %v544_v21 = vmax.f32 %v1670_v17, 0.0  ;;  %v497_v22 = vmax.f32 %v1674_v20, 0.0  ;;  %v377_v24 = vpop.f32.mrf.mxu1 }
  0xe4   :  { %593 = vst.msk [vmem:[%s2140_s3 + $0x2a8] sm:$0xff] %vm549_vm1, %v528_v19  ;;  %v1704_v26 = vadd.f32 %v1339_v61, %v377_v24 }
  0xe5   :  { %790 = vrot.lane.b32.xlu2 %v541_v48, %s1072_s5  ;;  %758 = vrot.lane.b32.xlu1 %v525_v47, %s1072_s5  ;;  %609 = vst.msk [vmem:[%s2140_s3 + $0x3a8] sm:$0xff] %vm549_vm1, %v544_v21 }
  0xe6   :  { %696 = vrot.lane.b32.xlu0 %v494_v49, %s1072_s5  ;;  %v743_v23 = vpop.permute.xlu2 %742  ;;  %562 = vst.msk [vmem:[%s2140_s3 + $0xc0] sm:$0xff] %vm549_vm1, %v497_v22  ;;  %v513_v29 = vmax.f32 %v1704_v26, 0.0 }
  0xe7   :  { %1035 = vst.msk [vmem:[%s2140_s3 + $0x210] sm:$0xff] %vm549_vm1, %v743_v23  ;;  %v425_v25 = vpop.f32.mrf.mxu2 }
  0xe8   :  { %v1707_v27 = vadd.f32 %v1339_v61, %v425_v25  ;;  %v473_v28 = vpop.f32.mrf.mxu3  ;;  %578 = vst.msk [vmem:[%s2140_s3 + $0x1c0] sm:$0xff] %vm549_vm1, %v513_v29  ;;  %v332_v34 = vpop.f32.mrf.mxu0 }
  0xe9   :  { %v1711_v30 = vadd.f32 %v1339_v61, %v473_v28  ;;  %v1743_v36 = vadd.f32 %v1339_v61, %v332_v34 }
  0xea   :  { %v529_v31 = vmax.f32 %v1707_v27, 0.0 }
  0xeb   :  { %v545_v32 = vmax.f32 %v1711_v30, 0.0  ;;  %v380_v35 = vpop.f32.mrf.mxu1  ;;  %v498_v40 = vmax.f32 %v1743_v36, 0.0 }
  0xec   :  { %594 = vst.msk [vmem:[%s2140_s3 + $0x2c0] sm:$0xff] %vm549_vm1, %v529_v31  ;;  %v1746_v37 = vadd.f32 %v1339_v61, %v380_v35 }
  0xed   :  { %760 = vrot.lane.b32.xlu2 %v526_v59, %s1072_s5  ;;  %728 = vrot.lane.b32.xlu1 %v510_v52, %s1072_s5  ;;  %610 = vst.msk [vmem:[%s2140_s3 + $0x3c0] sm:$0xff] %vm549_vm1, %v545_v32 }
  0xee   :  { %792 = vrot.lane.b32.xlu0 %v542_v60, %s1072_s5  ;;  %v713_v33 = vpop.permute.xlu2 %712  ;;  %v514_v41 = vmax.f32 %v1746_v37, 0.0  ;;  %563 = vst.msk [vmem:[%s2140_s3 + $0xc8] sm:$0xff] %vm549_vm1, %v498_v40 }
  0xef   :  { %1020 = vst.msk [vmem:[%s2140_s3 + $0x118] sm:$0xff] %vm549_vm1, %v713_v33  ;;  %v428_v38 = vpop.f32.mrf.mxu2 }
  0xf0   :  { %v1749_v39 = vadd.f32 %v1339_v61, %v428_v38  ;;  %579 = vst.msk [vmem:[%s2140_s3 + $0x1c8] sm:$0xff] %vm549_vm1, %v514_v41  ;;  %v335_v45 = vpop.f32.mrf.mxu0  ;;  %v476_v51 = vpop.f32.mrf.mxu3 }
  0xf1   :  { %v1788_v46 = vadd.f32 %v1339_v61, %v335_v45  ;;  %v1798_v54 = vadd.f32 %v1339_v61, %v476_v51 }
  0xf2   :  { %v530_v42 = vmax.f32 %v1749_v39, 0.0 }
  0xf3   :  { %v383_v47 = vpop.f32.mrf.mxu1  ;;  %v499_v53 = vmax.f32 %v1788_v46, 0.0  ;;  %v546_v57 = vmax.f32 %v1798_v54, 0.0 }
  0xf4   :  { %595 = vst.msk [vmem:[%s2140_s3 + $0x2c8] sm:$0xff] %vm549_vm1, %v530_v42  ;;  %v1791_v49 = vadd.f32 %v1339_v61, %v383_v47 }
  0xf5   :  { %730 = vrot.lane.b32.xlu2 %v511_v1, %s1072_s5  ;;  %698 = vrot.lane.b32.xlu1 %v495_v63, %s1072_s5  ;;  %564 = vst.msk [vmem:[%s2140_s3 + $0xe0] sm:$0xff] %vm549_vm1, %v499_v53 }
  0xf6   :  { %762 = vrot.lane.b32.xlu0 %v527_v8, %s1072_s5  ;;  %v515_v55 = vmax.f32 %v1791_v49, 0.0  ;;  %611 = vst.msk [vmem:[%s2140_s3 + $0x3c8] sm:$0xff] %vm549_vm1, %v546_v57 }
  0xf7   :  { %v779_v43 = vpop.permute.xlu2 %778  ;;  %v679_v44 = vpop.permute.xlu0 %678 }
  0xf8   :  { %1053 = vst.msk [vmem:[%s2140_s3 + $0x330] sm:$0xff] %vm549_vm1, %v779_v43  ;;  %v431_v48 = vpop.f32.mrf.mxu2  ;;  %v338_v1 = vpop.f32.mrf.mxu0 }
  0xf9   :  { %1003 = vst.msk [vmem:[%s2140_s3 + $0x10] sm:$0xff] %vm549_vm1, %v679_v44  ;;  %v1794_v50 = vadd.f32 %v1339_v61, %v431_v48  ;;  %v479_v2 = vpop.f32.mrf.mxu3  ;;  %v339_v3 = vadd.f32 %v1339_v61, %v338_v1 }
  0xfa   :  { %v711_v52 = vpop.permute.xlu1 %710  ;;  %580 = vst.msk [vmem:[%s2140_s3 + $0x1e0] sm:$0xff] %vm549_vm1, %v515_v55  ;;  %v480_v5 = vadd.f32 %v1339_v61, %v479_v2 }
  0xfb   :  { %1019 = vst.msk [vmem:[%s2140_s3 + $0x110] sm:$0xff] %vm549_vm1, %v711_v52  ;;  %v531_v56 = vmax.f32 %v1794_v50, 0.0  ;;  %v386_v60 = vpop.f32.mrf.mxu1 }
  0xfc   :  { %v387_v63 = vadd.f32 %v1339_v61, %v386_v60 }
  0xfd   :  { %700 = vrot.lane.b32.xlu2 %v496_v9, %s1072_s5  ;;  %794 = vrot.lane.b32.xlu1 %v543_v11, %s1072_s5  ;;  %596 = vst.msk [vmem:[%s2140_s3 + $0x2e0] sm:$0xff] %vm549_vm1, %v531_v56  ;;  %v500_v9 = vmax.f32 %v339_v3, 0.0  ;;  %v547_v11 = vmax.f32 %v480_v5, 0.0 }
  0xfe   :  { %732 = vrot.lane.b32.xlu0 %v512_v13, %s1072_s5  ;;  %v516_v4 = vmax.f32 %v387_v63, 0.0 }
  0xff   :  { %v749_v58 = vpop.permute.xlu2 %748  ;;  %v775_v59 = vpop.permute.xlu0 %774  ;;  %565 = vst.msk [vmem:[%s2140_s3 + $0xe8] sm:$0xff] %vm549_vm1, %v500_v9 }
 0x100   :  { %1038 = vst.msk [vmem:[%s2140_s3 + $0x238] sm:$0xff] %vm549_vm1, %v749_v58  ;;  %v434_v62 = vpop.f32.mrf.mxu2 }
 0x101   :  { %1051 = vst.msk [vmem:[%s2140_s3 + $0x310] sm:$0xff] %vm549_vm1, %v775_v59  ;;  %v435_v0 = vadd.f32 %v1339_v61, %v434_v62  ;;  %v482_v12 = vpop.f32.mrf.mxu3 }
 0x102   :  { %581 = vst.msk [vmem:[%s2140_s3 + $0x1e8] sm:$0xff] %vm549_vm1, %v516_v4  ;;  %v483_v13 = vadd.f32 %v1339_v61, %v482_v12 }
 0x103   :  { %v532_v6 = vmax.f32 %v435_v0, 0.0  ;;  %612 = vst.msk [vmem:[%s2140_s3 + $0x3e0] sm:$0xff] %vm549_vm1, %v547_v11 }
 0x104   :  { %v548_v14 = vmax.f32 %v483_v13, 0.0 }
 0x105   :  { %796 = vrot.lane.b32.xlu2 %v544_v21, %s1072_s5  ;;  %764 = vrot.lane.b32.xlu1 %v528_v19, %s1072_s5  ;;  %597 = vst.msk [vmem:[%s2140_s3 + $0x2e8] sm:$0xff] %vm549_vm1, %v532_v6 }
 0x106   :  { %702 = vrot.lane.b32.xlu0 %v497_v22, %s1072_s5  ;;  %613 = vst.msk [vmem:[%s2140_s3 + $0x3e8] sm:$0xff] %vm549_vm1, %v548_v14 }
 0x107   :  { %v777_v7 = vpop.permute.xlu1 %776  ;;  %v687_v8 = vpop.permute.xlu2 %686 }
 0x108   :  { %1052 = vst.msk [vmem:[%s2140_s3 + $0x318] sm:$0xff] %vm549_vm1, %v777_v7  ;;  %v681_v10 = vpop.permute.xlu0 %680 }
 0x109   :  { %1007 = vst.msk [vmem:[%s2140_s3 + $0x50] sm:$0xff] %vm549_vm1, %v687_v8 }
 0x10a   :  { %1004 = vst.msk [vmem:[%s2140_s3 + $0x18] sm:$0xff] %vm549_vm1, %v681_v10 }
 0x10d   :  { %766 = vrot.lane.b32.xlu2 %v529_v31, %s1072_s5  ;;  %734 = vrot.lane.b32.xlu1 %v513_v29, %s1072_s5 }
 0x10e   :  { %798 = vrot.lane.b32.xlu0 %v545_v32, %s1072_s5 }
 0x10f   :  { %v719_v15 = vpop.permute.xlu2 %718  ;;  %v683_v61 = vpop.permute.xlu1 %682 }
 0x110   :  { %1023 = vst.msk [vmem:[%s2140_s3 + $0x150] sm:$0xff] %vm549_vm1, %v719_v15  ;;  %v745_v16 = vpop.permute.xlu0 %744 }
 0x111   :  { %1005 = vst.msk [vmem:[%s2140_s3 + $0x30] sm:$0xff] %vm549_vm1, %v683_v61 }
 0x112   :  { %1036 = vst.msk [vmem:[%s2140_s3 + $0x218] sm:$0xff] %vm549_vm1, %v745_v16 }
 0x115   :  { %736 = vrot.lane.b32.xlu2 %v514_v41, %s1072_s5  ;;  %704 = vrot.lane.b32.xlu1 %v498_v40, %s1072_s5 }
 0x116   :  { %768 = vrot.lane.b32.xlu0 %v530_v42, %s1072_s5 }
 0x117   :  { %v689_v17 = vpop.permute.xlu2 %688  ;;  %v747_v18 = vpop.permute.xlu1 %746 }
 0x118   :  { %1008 = vst.msk [vmem:[%s2140_s3 + $0x58] sm:$0xff] %vm549_vm1, %v689_v17  ;;  %v715_v19 = vpop.permute.xlu0 %714 }
 0x119   :  { %1037 = vst.msk [vmem:[%s2140_s3 + $0x230] sm:$0xff] %vm549_vm1, %v747_v18 }
 0x11a   :  { %1021 = vst.msk [vmem:[%s2140_s3 + $0x130] sm:$0xff] %vm549_vm1, %v715_v19 }
 0x11d   :  { %706 = vrot.lane.b32.xlu2 %v499_v53, %s1072_s5  ;;  %770 = vrot.lane.b32.xlu1 %v531_v56, %s1072_s5 }
 0x11e   :  { %738 = vrot.lane.b32.xlu0 %v515_v55, %s1072_s5 }
 0x11f   :  { %v785_v20 = vpop.permute.xlu2 %784  ;;  %v685_v21 = vpop.permute.xlu1 %684 }
 0x120   :  { %1056 = vst.msk [vmem:[%s2140_s3 + $0x358] sm:$0xff] %vm549_vm1, %v785_v20  ;;  %v781_v22 = vpop.permute.xlu0 %780 }
 0x121   :  { %1006 = vst.msk [vmem:[%s2140_s3 + $0x38] sm:$0xff] %vm549_vm1, %v685_v21 }
 0x122   :  { %1054 = vst.msk [vmem:[%s2140_s3 + $0x338] sm:$0xff] %vm549_vm1, %v781_v22 }
 0x125   :  { %772 = vrot.lane.b32.xlu2 %v532_v6, %s1072_s5  ;;  %740 = vrot.lane.b32.xlu1 %v516_v4, %s1072_s5 }
 0x126   :  { %708 = vrot.lane.b32.xlu0 %v500_v9, %s1072_s5 }
 0x127   :  { %v755_v23 = vpop.permute.xlu2 %754  ;;  %v717_v24 = vpop.permute.xlu1 %716 }
 0x128   :  { %1041 = vst.msk [vmem:[%s2140_s3 + $0x270] sm:$0xff] %vm549_vm1, %v755_v23  ;;  %v751_v25 = vpop.permute.xlu0 %750 }
 0x129   :  { %1022 = vst.msk [vmem:[%s2140_s3 + $0x138] sm:$0xff] %vm549_vm1, %v717_v24 }
 0x12a   :  { %1039 = vst.msk [vmem:[%s2140_s3 + $0x250] sm:$0xff] %vm549_vm1, %v751_v25 }
 0x12d   :  { %802 = vrot.lane.b32.xlu2 %v547_v11, %s1072_s5  ;;  %800 = vrot.lane.b32.xlu1 %v546_v57, %s1072_s5 }
 0x12e   :  { %804 = vrot.lane.b32.xlu0 %v548_v14, %s1072_s5 }
 0x12f   :  { %v725_v26 = vpop.permute.xlu2 %724  ;;  %v783_v27 = vpop.permute.xlu1 %782 }
 0x130   :  { %1026 = vst.msk [vmem:[%s2140_s3 + $0x178] sm:$0xff] %vm549_vm1, %v725_v26  ;;  %v721_v28 = vpop.permute.xlu0 %720 }
 0x131   :  { %1055 = vst.msk [vmem:[%s2140_s3 + $0x350] sm:$0xff] %vm549_vm1, %v783_v27 }
 0x132   :  { %1024 = vst.msk [vmem:[%s2140_s3 + $0x158] sm:$0xff] %vm549_vm1, %v721_v28 }
 0x137   :  { %v695_v29 = vpop.permute.xlu2 %694  ;;  %v753_v30 = vpop.permute.xlu1 %752 }
 0x138   :  { %1011 = vst.msk [vmem:[%s2140_s3 + $0x90] sm:$0xff] %vm549_vm1, %v695_v29  ;;  %v691_v31 = vpop.permute.xlu0 %690 }
 0x139   :  { %1040 = vst.msk [vmem:[%s2140_s3 + $0x258] sm:$0xff] %vm549_vm1, %v753_v30 }
 0x13a   :  { %1009 = vst.msk [vmem:[%s2140_s3 + $0x70] sm:$0xff] %vm549_vm1, %v691_v31 }
 0x13f   :  { %v791_v32 = vpop.permute.xlu2 %790  ;;  %v723_v33 = vpop.permute.xlu1 %722 }
 0x140   :  { %1059 = vst.msk [vmem:[%s2140_s3 + $0x390] sm:$0xff] %vm549_vm1, %v791_v32  ;;  %v787_v34 = vpop.permute.xlu0 %786 }
 0x141   :  { %1025 = vst.msk [vmem:[%s2140_s3 + $0x170] sm:$0xff] %vm549_vm1, %v723_v33 }
 0x142   :  { %1057 = vst.msk [vmem:[%s2140_s3 + $0x370] sm:$0xff] %vm549_vm1, %v787_v34 }
 0x147   :  { %v761_v35 = vpop.permute.xlu2 %760  ;;  %v693_v36 = vpop.permute.xlu1 %692 }
 0x148   :  { %1044 = vst.msk [vmem:[%s2140_s3 + $0x298] sm:$0xff] %vm549_vm1, %v761_v35  ;;  %v757_v37 = vpop.permute.xlu0 %756 }
 0x149   :  { %1010 = vst.msk [vmem:[%s2140_s3 + $0x78] sm:$0xff] %vm549_vm1, %v693_v36 }
 0x14a   :  { %1042 = vst.msk [vmem:[%s2140_s3 + $0x278] sm:$0xff] %vm549_vm1, %v757_v37 }
 0x14f   :  { %v731_v38 = vpop.permute.xlu2 %730  ;;  %v789_v39 = vpop.permute.xlu1 %788 }
 0x150   :  { %1029 = vst.msk [vmem:[%s2140_s3 + $0x1b0] sm:$0xff] %vm549_vm1, %v731_v38  ;;  %v727_v40 = vpop.permute.xlu0 %726 }
 0x151   :  { %1058 = vst.msk [vmem:[%s2140_s3 + $0x378] sm:$0xff] %vm549_vm1, %v789_v39 }
 0x152   :  { %1027 = vst.msk [vmem:[%s2140_s3 + $0x190] sm:$0xff] %vm549_vm1, %v727_v40 }
 0x157   :  { %v701_v41 = vpop.permute.xlu2 %700  ;;  %v759_v42 = vpop.permute.xlu1 %758 }
 0x158   :  { %1014 = vst.msk [vmem:[%s2140_s3 + $0xb8] sm:$0xff] %vm549_vm1, %v701_v41  ;;  %v697_v43 = vpop.permute.xlu0 %696 }
 0x159   :  { %1043 = vst.msk [vmem:[%s2140_s3 + $0x290] sm:$0xff] %vm549_vm1, %v759_v42 }
 0x15a   :  { %1012 = vst.msk [vmem:[%s2140_s3 + $0x98] sm:$0xff] %vm549_vm1, %v697_v43 }
 0x15f   :  { %v797_v44 = vpop.permute.xlu2 %796  ;;  %v729_v45 = vpop.permute.xlu1 %728 }
 0x160   :  { %1062 = vst.msk [vmem:[%s2140_s3 + $0x3b8] sm:$0xff] %vm549_vm1, %v797_v44  ;;  %v793_v46 = vpop.permute.xlu0 %792 }
 0x161   :  { %1028 = vst.msk [vmem:[%s2140_s3 + $0x198] sm:$0xff] %vm549_vm1, %v729_v45 }
 0x162   :  { %1060 = vst.msk [vmem:[%s2140_s3 + $0x398] sm:$0xff] %vm549_vm1, %v793_v46 }
 0x167   :  { %v767_v47 = vpop.permute.xlu2 %766  ;;  %v699_v48 = vpop.permute.xlu1 %698 }
 0x168   :  { %1047 = vst.msk [vmem:[%s2140_s3 + $0x2d0] sm:$0xff] %vm549_vm1, %v767_v47  ;;  %v763_v49 = vpop.permute.xlu0 %762 }
 0x169   :  { %1013 = vst.msk [vmem:[%s2140_s3 + $0xb0] sm:$0xff] %vm549_vm1, %v699_v48 }
 0x16a   :  { %1045 = vst.msk [vmem:[%s2140_s3 + $0x2b0] sm:$0xff] %vm549_vm1, %v763_v49 }
 0x16f   :  { %v737_v50 = vpop.permute.xlu2 %736  ;;  %v795_v51 = vpop.permute.xlu1 %794 }
 0x170   :  { %1032 = vst.msk [vmem:[%s2140_s3 + $0x1d8] sm:$0xff] %vm549_vm1, %v737_v50  ;;  %v733_v52 = vpop.permute.xlu0 %732 }
 0x171   :  { %1061 = vst.msk [vmem:[%s2140_s3 + $0x3b0] sm:$0xff] %vm549_vm1, %v795_v51 }
 0x172   :  { %1030 = vst.msk [vmem:[%s2140_s3 + $0x1b8] sm:$0xff] %vm549_vm1, %v733_v52 }
 0x177   :  { %v707_v53 = vpop.permute.xlu2 %706  ;;  %v765_v54 = vpop.permute.xlu1 %764 }
 0x178   :  { %1017 = vst.msk [vmem:[%s2140_s3 + $0xf0] sm:$0xff] %vm549_vm1, %v707_v53  ;;  %v703_v55 = vpop.permute.xlu0 %702 }
 0x179   :  { %1046 = vst.msk [vmem:[%s2140_s3 + $0x2b8] sm:$0xff] %vm549_vm1, %v765_v54 }
 0x17a   :  { %1015 = vst.msk [vmem:[%s2140_s3 + $0xd0] sm:$0xff] %vm549_vm1, %v703_v55 }
 0x17f   :  { %v773_v56 = vpop.permute.xlu2 %772  ;;  %v735_v57 = vpop.permute.xlu1 %734 }
 0x180   :  { %1050 = vst.msk [vmem:[%s2140_s3 + $0x2f8] sm:$0xff] %vm549_vm1, %v773_v56  ;;  %v799_v58 = vpop.permute.xlu0 %798 }
 0x181   :  { %1031 = vst.msk [vmem:[%s2140_s3 + $0x1d0] sm:$0xff] %vm549_vm1, %v735_v57 }
 0x182   :  { %1063 = vst.msk [vmem:[%s2140_s3 + $0x3d0] sm:$0xff] %vm549_vm1, %v799_v58 }
 0x187   :  { %v803_v59 = vpop.permute.xlu2 %802  ;;  %v705_v60 = vpop.permute.xlu1 %704 }
 0x188   :  { %1065 = vst.msk [vmem:[%s2140_s3 + $0x3f0] sm:$0xff] %vm549_vm1, %v803_v59  ;;  %v769_v62 = vpop.permute.xlu0 %768 }
 0x189   :  { %1016 = vst.msk [vmem:[%s2140_s3 + $0xd8] sm:$0xff] %vm549_vm1, %v705_v60 }
 0x18a   :  { %1048 = vst.msk [vmem:[%s2140_s3 + $0x2d8] sm:$0xff] %vm549_vm1, %v769_v62 }
 0x18f   :  { %v771_v63 = vpop.permute.xlu1 %770 }
 0x190   :  { %1049 = vst.msk [vmem:[%s2140_s3 + $0x2f0] sm:$0xff] %vm549_vm1, %v771_v63  ;;  %v739_v0 = vpop.permute.xlu0 %738 }
 0x191   :  { %1033 = vst.msk [vmem:[%s2140_s3 + $0x1f0] sm:$0xff] %vm549_vm1, %v739_v0 }
 0x197   :  { %v741_v1 = vpop.permute.xlu1 %740 }
 0x198   :  { %1034 = vst.msk [vmem:[%s2140_s3 + $0x1f8] sm:$0xff] %vm549_vm1, %v741_v1  ;;  %v709_v2 = vpop.permute.xlu0 %708 }
 0x199   :  { %1018 = vst.msk [vmem:[%s2140_s3 + $0xf8] sm:$0xff] %vm549_vm1, %v709_v2 }
 0x19f   :  { %v801_v3 = vpop.permute.xlu1 %800 }
 0x1a0   :  { %1064 = vst.msk [vmem:[%s2140_s3 + $0x3d8] sm:$0xff] %vm549_vm1, %v801_v3  ;;  %v805_v4 = vpop.permute.xlu0 %804 }
 0x1a1   :  { %1066 = vst.msk [vmem:[%s2140_s3 + $0x3f8] sm:$0xff] %vm549_vm1, %v805_v4 }

</bundles_post_ra>
